<compile_context>
chip_gen: v6e
topology: v6e:2x2x1
jax: 0.10.0
libtpu: 0.0.40
codegen_flags: <defaults>
</compile_context>

<pallas_src>
import functools

import jax
import jax.numpy as jnp
from jax import lax
from jax.experimental import pallas as pl
from jax.experimental.pallas import tpu as pltpu


def _round_up(a, m):
    return (a + m - 1) // m * m


def _vmem_capacity_bytes():
    try:
        info = pltpu.get_tpu_info()
        cap = int(getattr(info, "vmem_capacity_bytes", 0) or 0)
        if cap > 0:
            return cap
    except Exception:
        pass
    return 64 * 1024 * 1024  # conservative fallback (v7x-sized VMEM)


def _ln_fulld_kernel(coef_ref, x_ref, o_ref, *, norm_scale, inv_d, eps):
    """Whole normalization axis (D) resident in one VMEM block.

    Two-pass variance (mean, then centered sum of squares): the tile is already
    in VMEM so the extra sweep costs no HBM traffic and avoids the
    E[x^2]-E[x]^2 catastrophic-cancellation problem. Rows past N (ragged last
    block) produce garbage only in their own row; their stores are masked.
    """
    x = x_ref[...].astype(jnp.float32)
    mean = jnp.sum(x, axis=1, keepdims=True) * inv_d
    xc = x - mean
    var = jnp.sum(xc * xc, axis=1, keepdims=True) * inv_d
    inv_scaled = lax.rsqrt(var + eps) * norm_scale          # (TN, 1), EUP rsqrt
    coef = coef_ref[0]                                       # shortcut*alpha (0 if no residual)
    # y = norm_scale * (x - mean) * rsqrt(var + eps) + coef * x
    o_ref[...] = (xc * inv_scaled + x * coef).astype(o_ref.dtype)


def _ln_splitd_kernel(coef_ref, x_ref, o_ref, s1_ref, s2_ref, *,
                      norm_scale, inv_d, eps, kb, tk, d):
    """Large-D fallback: D split into kb chunks of tk lanes; grid axis 1 runs
    2*kb steps. Phase 1 (k < kb) streams x once accumulating sum / sum-of-squares
    into f32 VMEM scratch; phase 2 (k >= kb) re-streams x and emits the output
    chunk-by-chunk (each x block is read twice, written once).
    """
    k = pl.program_id(1)

    @pl.when(k == 0)
    def _init():
        s1_ref[...] = jnp.zeros_like(s1_ref)
        s2_ref[...] = jnp.zeros_like(s2_ref)

    x = x_ref[...].astype(jnp.float32)

    @pl.when(k < kb)
    def _stats():
        xm = x
        if d % tk != 0:
            # Mask lanes past the true D (only the last chunk is ragged) so the
            # unspecified out-of-bounds lanes cannot corrupt the statistics.
            col = lax.broadcasted_iota(jnp.int32, x.shape, 1) + k * tk
            xm = jnp.where(col < d, x, 0.0)
        s1_ref[...] += jnp.sum(xm, axis=1, keepdims=True)
        s2_ref[...] += jnp.sum(xm * xm, axis=1, keepdims=True)

    @pl.when(k >= kb)
    def _emit():
        mean = s1_ref[...] * inv_d
        var = jnp.maximum(s2_ref[...] * inv_d - mean * mean, 0.0)
        inv_scaled = lax.rsqrt(var + eps) * norm_scale
        a = inv_scaled + coef_ref[0]
        b = mean * inv_scaled
        # y = norm_scale*(x-mean)*inv + coef*x == x*(inv_scaled+coef) - mean*inv_scaled
        o_ref[...] = (x * a - b).astype(o_ref.dtype)


def res_layernorm2d(x, alpha=None, *, norm_scale, shortcut=None, eps=1e-5,
                    donate_x=False, _block_budget_override=None):
    """x: (N, C, H, W). alpha: scalar array (only used when shortcut is not None)."""
    N, C, H, W = x.shape
    D = C * H * W
    x2d = x.reshape(N, D)                      # free: contiguous NCHW -> (N, D)

    itemsize = jnp.dtype(x.dtype).itemsize
    sublane = max(8, 32 // itemsize)           # 8 f32, 16 bf16, 32 int8
    lane_d = _round_up(D, 128)                 # physical lanes per row in VMEM
    row_vmem_bytes = lane_d * itemsize

    # Generation-aware budgets: big blocks on 128-MiB parts (v5e/v6e), tighter on
    # 64-MiB v7x-class parts, always leaving headroom for Mosaic internal scratch.
    vmem_cap = _vmem_capacity_bytes()
    if vmem_cap >= 100 * 1024 * 1024:
        block_budget = 8 * 1024 * 1024
        vmem_limit = 64 * 1024 * 1024
    else:
        block_budget = 4 * 1024 * 1024
        vmem_limit = min(40 * 1024 * 1024, vmem_cap * 5 // 8)
    if _block_budget_override is not None:     # test hook: force the split-D path
        block_budget = int(_block_budget_override)

    # Fold the residual coefficient (shortcut * alpha) into one SMEM scalar;
    # 0.0 reproduces the no-residual branch exactly.
    if shortcut is not None:
        coef = (jnp.asarray(shortcut, jnp.float32) *
                jnp.asarray(alpha, jnp.float32)).reshape(1)
    else:
        coef = jnp.zeros((1,), jnp.float32)

    common = dict(norm_scale=float(norm_scale), inv_d=1.0 / float(D), eps=float(eps))
    smem_spec = pl.BlockSpec(memory_space=pltpu.MemorySpace.SMEM)
    io_alias = {1: 0} if donate_x else {}      # only when the caller truly donates x
    out_shape = jax.ShapeDtypeStruct((N, D), x.dtype)

    if sublane * row_vmem_bytes <= block_budget:
        # ---- Full-D path: each grid step owns (tn, D); single streaming pass. ----
        tn = max(sublane, (block_budget // row_vmem_bytes) // sublane * sublane)
        # Keep ~>=8 grid steps so v7x megacore can split rows and the DMA pipeline
        # has something to overlap (ragged tail handled by masked boundary DMAs).
        tn = min(tn, _round_up(pl.cdiv(N, 8), sublane))
        grid = (pl.cdiv(N, tn),)
        out2d = pl.pallas_call(
            functools.partial(_ln_fulld_kernel, **common),
            out_shape=out_shape,
            grid=grid,
            in_specs=[smem_spec, pl.BlockSpec((tn, D), lambda i: (i, 0))],
            out_specs=pl.BlockSpec((tn, D), lambda i: (i, 0)),
            input_output_aliases=io_alias,
            compiler_params=pltpu.CompilerParams(
                dimension_semantics=("parallel",),
                vmem_limit_bytes=vmem_limit,
            ),
        )(coef, x2d)
    else:
        # ---- Split-D path (very large C*H*W): rows stay minimal, D is chunked. ----
        tn = sublane
        tk = max(128, (block_budget // (tn * itemsize)) // 128 * 128)
        tk = min(tk, lane_d)
        kb = pl.cdiv(D, tk)
        grid = (pl.cdiv(N, tn), 2 * kb)        # phase 1: stats, phase 2: write
        out2d = pl.pallas_call(
            functools.partial(_ln_splitd_kernel, **common, kb=kb, tk=tk, d=D),
            out_shape=out_shape,
            grid=grid,
            in_specs=[smem_spec,
                      pl.BlockSpec((tn, tk), lambda i, k: (i, k % kb))],
            out_specs=pl.BlockSpec((tn, tk),
                                   lambda i, k: (i, jnp.maximum(k - kb, 0))),
            scratch_shapes=[pltpu.VMEM((tn, 1), jnp.float32),
                            pltpu.VMEM((tn, 1), jnp.float32)],
            input_output_aliases=io_alias,
            compiler_params=pltpu.CompilerParams(
                dimension_semantics=("parallel", "arbitrary"),
                vmem_limit_bytes=vmem_limit,
            ),
        )(coef, x2d)

    return out2d.reshape(N, C, H, W)


def _reference(x, alpha, *, norm_scale, shortcut=None, eps=1e-5):
    # Pure-JAX reference: norm_scale * F.layer_norm(x, x.shape[1:]) [+ shortcut*alpha*x]
    N = x.shape[0]
    xf = x.reshape(N, -1).astype(jnp.float32)
    mean = jnp.mean(xf, axis=1, keepdims=True)
    var = jnp.mean((xf - mean) ** 2, axis=1, keepdims=True)
    y = norm_scale * (xf - mean) / jnp.sqrt(var + eps)
    if shortcut is not None:
        y = y + shortcut * alpha * xf
    return y.reshape(x.shape).astype(x.dtype)


if __name__ == "__main__":
    key = jax.random.PRNGKey(0)
    k1, k2, k3 = jax.random.split(key, 3)
    norm_scale = 0.7
    shortcut = 0.5            # ResLayerNorm2d(short_cut=0.5) -> alpha parameter exists
    alpha = jnp.float32(1.0)  # nn.Parameter(torch.tensor(1.0)), deterministic init

    # Case 1: residual branch, D = 4*16*16 = 1024 (full-D path).
    x = jax.random.normal(k1, (2, 4, 16, 16), dtype=jnp.float32)
    out = jax.block_until_ready(res_layernorm2d(x, alpha, norm_scale=norm_scale, shortcut=shortcut))
    ref = _reference(x, alpha, norm_scale=norm_scale, shortcut=shortcut)
    assert jnp.allclose(out, ref, atol=1e-4, rtol=1e-4), "mismatch (residual path)"

    # Case 2: no-residual branch (coef = 0).
    out2 = jax.block_until_ready(res_layernorm2d(x, alpha, norm_scale=norm_scale, shortcut=None))
    ref2 = _reference(x, alpha, norm_scale=norm_scale, shortcut=None)
    assert jnp.allclose(out2, ref2, atol=1e-4, rtol=1e-4), "mismatch (plain path)"

    # Case 3: D = 3*10*10 = 300 (not 128-aligned) and N = 10 (ragged last row block).
    x3 = jax.random.normal(k2, (10, 3, 10, 10), dtype=jnp.float32) * 2.0 + 0.3
    out3 = jax.block_until_ready(res_layernorm2d(x3, alpha, norm_scale=norm_scale, shortcut=shortcut))
    ref3 = _reference(x3, alpha, norm_scale=norm_scale, shortcut=shortcut)
    assert jnp.allclose(out3, ref3, atol=1e-4, rtol=1e-4), "mismatch (ragged N / unaligned D)"

    # Case 4: force the split-D path with a tiny block budget; D divisible by tk.
    out4 = jax.block_until_ready(res_layernorm2d(
        x, alpha, norm_scale=norm_scale, shortcut=shortcut, _block_budget_override=16 * 1024))
    assert jnp.allclose(out4, ref, atol=1e-4, rtol=1e-4), "mismatch (split-D aligned)"

    # Case 5: split-D path with a ragged last D chunk (exercises the in-kernel lane mask).
    x5 = jax.random.normal(k3, (2, 3, 10, 10), dtype=jnp.float32) * 2.0 + 0.3
    out5 = jax.block_until_ready(res_layernorm2d(
        x5, alpha, norm_scale=norm_scale, shortcut=shortcut, _block_budget_override=4 * 1024))
    ref5 = _reference(x5, alpha, norm_scale=norm_scale, shortcut=shortcut)
    assert jnp.allclose(out5, ref5, atol=1e-4, rtol=1e-4), "mismatch (split-D ragged)"

    print("KERNEL_OK")
</pallas_src>

<mosaic_0001>
module attributes {stable_mosaic.version = 11 : i64} {
  func.func @_ln_fulld_kernel(%arg0: i32, %arg1: memref<1xf32, #tpu.memory_space<smem>>, %arg2: memref<8x1024xf32, #tpu.memory_space<vmem>>, %arg3: memref<8x1024xf32, #tpu.memory_space<vmem>>) attributes {dimension_semantics = [#tpu.dimension_semantics<parallel>], iteration_bounds = array<i64: 1>, scalar_prefetch = 0 : i64, scratch_operands = 0 : i64, tpu.core_type = #tpu.core_type<tc>, window_params = [{transform_indices = @transform_0, window_bounds = array<i64: 1>}, {transform_indices = @transform_1, window_bounds = array<i64: 8, 1024>}, {transform_indices = @transform_2, window_bounds = array<i64: 8, 1024>}]} {
    %c0 = arith.constant 0 : index
    %c0_0 = arith.constant 0 : index
    %0 = vector.load %arg2[%c0, %c0_0] : memref<8x1024xf32, #tpu.memory_space<vmem>>, vector<8x1024xf32>
    %cst = arith.constant dense<0.000000e+00> : vector<8xf32>
    %1 = vector.multi_reduction <add>, %0, %cst [1] : vector<8x1024xf32> to vector<8xf32>
    %2 = vector.shape_cast %1 : vector<8xf32> to vector<8x1xf32>
    %cst_1 = arith.constant 9.765625E-4 : f32
    %3 = vector.broadcast %cst_1 : f32 to vector<8x1xf32>
    %4 = arith.mulf %2, %3 : vector<8x1xf32>
    %5 = vector.broadcast %4 : vector<8x1xf32> to vector<8x1024xf32>
    %6 = arith.subf %0, %5 : vector<8x1024xf32>
    %7 = arith.mulf %6, %6 : vector<8x1024xf32>
    %cst_2 = arith.constant dense<0.000000e+00> : vector<8xf32>
    %8 = vector.multi_reduction <add>, %7, %cst_2 [1] : vector<8x1024xf32> to vector<8xf32>
    %9 = vector.shape_cast %8 : vector<8xf32> to vector<8x1xf32>
    %cst_3 = arith.constant 9.765625E-4 : f32
    %10 = vector.broadcast %cst_3 : f32 to vector<8x1xf32>
    %11 = arith.mulf %9, %10 : vector<8x1xf32>
    %cst_4 = arith.constant 9.99999974E-6 : f32
    %12 = vector.broadcast %cst_4 : f32 to vector<8x1xf32>
    %13 = arith.addf %11, %12 : vector<8x1xf32>
    %14 = math.rsqrt %13 : vector<8x1xf32>
    %cst_5 = arith.constant 0.699999988 : f32
    %15 = vector.broadcast %cst_5 : f32 to vector<8x1xf32>
    %16 = arith.mulf %14, %15 : vector<8x1xf32>
    %c0_6 = arith.constant 0 : index
    %17 = memref.load %arg1[%c0_6] : memref<1xf32, #tpu.memory_space<smem>>
    %18 = vector.broadcast %16 : vector<8x1xf32> to vector<8x1024xf32>
    %19 = arith.mulf %6, %18 : vector<8x1024xf32>
    %20 = vector.broadcast %17 : f32 to vector<8x1024xf32>
    %21 = arith.mulf %0, %20 : vector<8x1024xf32>
    %22 = arith.addf %19, %21 : vector<8x1024xf32>
    %c0_7 = arith.constant 0 : index
    %c0_8 = arith.constant 0 : index
    %23 = vector.load %arg3[%c0_7, %c0_8] : memref<8x1024xf32, #tpu.memory_space<vmem>>, vector<8x1024xf32>
    tpu.vector_store %arg3[%c0_7, %c0_8], %22 {strides = array<i32>} : memref<8x1024xf32, #tpu.memory_space<vmem>>, vector<8x1024xf32>,
    return
  }
  func.func @transform_0(%arg0: i32) -> i32 {
    %c0_i32 = arith.constant 0 : i32
    %c0_i32_0 = arith.constant 0 : i32
    return %c0_i32 : i32
  }
  func.func @transform_1(%arg0: i32) -> (i32, i32) {
    %c0_i32 = arith.constant 0 : i32
    %c0_i32_0 = arith.constant 0 : i32
    return %arg0, %c0_i32 : i32, i32
  }
  func.func @transform_2(%arg0: i32) -> (i32, i32) {
    %c0_i32 = arith.constant 0 : i32
    %c0_i32_0 = arith.constant 0 : i32
    return %arg0, %c0_i32 : i32, i32
  }
}

</mosaic_0001>

<bundles_post_ra>
// kernel: tpu_custom_call.1
= control target key start
LH: loop header
LB: loop body
LE: loop exit
PB: predicated region body
PF: predicated region fallthrough
CT: control target
= control target key end

     0   :  { %8 = vsyncpa [#allocation4], 0  ;;  %s591_s0 = inlined_call_operand.<no memory space> [shape: f32[1], index: 0, kind: input, shape index: {}]   ;;  %s592_s1 = inlined_call_operand.hbm [shape: f32[2,1024], index: 1, kind: input, shape index: {}]   ;;  %s593_s2 = inlined_call_operand.hbm [shape: f32[2,1024], index: 2, kind: output, shape index: {}]  }
   0x1   :  { %9 = vsyncpa [#allocation5], 0 }
   0x2   :  { %16 = vsyncadd [#allocation4], 768  ;;  %s430_s9 = smov [#allocation3]  }
   0x3   :  { %s17_s10 = sshll.u32 %s430_s9, 4  ;;  %s18_s10 = int_to_ptr.vmem [resolvable:$true] %s17_s10 }
   0x4   :  { %s394_s11 = scalar_lea.vmem %s18_s10, 256  ;;  %s398_s12 = scalar_lea.vmem %s18_s10, 1024 }
   0x5   :  { %p395_p0 = scmp.ne.s32.totalorder %s18_s10, %s394_s11  ;;  %p399_p1 = scmp.lt.s32.totalorder %s18_s10, %s18_s10 }
   0x6   :  { %p400_p2 = scmp.lt.s32.totalorder %s398_s12, %s394_s11 }
   0x8   :  { %p401_p3 = por %p400_p2, %p399_p1 }
   0xa   :  { %p402_p4 = pnand %p401_p3, %p395_p0 }
   0xc   :  { %405 = shalt.err (!%p402_p4)
}
   0xd   :  { %s431_s13 = smov 256   ;;  %s432_s14 = smov 16  }
   0xe   :  { %23 = dma.hbm_to_vmem [thread:$0]  %s592_s1, 256, %s18_s10, [#allocation4], %s431_s13, %s431_s13, %s432_s14  }
   0xf   :  { %426 = dma.done.wait [#allocation4], 1024  }
  0x10   :  { %427 = vsyncadd [#allocation4], 4294966272  ;;  %v50_v0 = vlaneseq  ;;  %v433_v1 = vmov 1983009808   ;;  %v462_v6 = vld [vmem:[#allocation3] sm:$0xff]  ;;  %v464_v7 = vld [vmem:[#allocation3 + $0x8] sm:$0xff] }
  0x11   :  { %v48_v2 = vunpack.c.l.s4 %v433_v1  ;;  %v466_v8 = vld [vmem:[#allocation3 + $0x10] sm:$0xff]  ;;  %v468_v9 = vld [vmem:[#allocation3 + $0x18] sm:$0xff]  ;;  %v470_v10 = vld [vmem:[#allocation3 + $0x20] sm:$0xff]  ;;  %v434_v45 = vmov 269488144  }
  0x12   :  { %v51_v3 = vshrl.u32 %v50_v0, 7  ;;  %v472_v11 = vld [vmem:[#allocation3 + $0x28] sm:$0xff]  ;;  %v43_v12 = vcombine.low %v462_v6, %v466_v8  ;;  %v44_v13 = vcombine.high %v462_v6, %v466_v8  ;;  %v478_v14 = vld [vmem:[#allocation3 + $0x30] sm:$0xff]  ;;  %v480_v15 = vld [vmem:[#allocation3 + $0x38] sm:$0xff]  ;;  %v79_v16 = vcombine.low %v464_v7, %v468_v9 }
  0x13   :  { %v49_v4 = vunpack.c.0.s8 %v48_v2  ;;  %v45_v17 = vcombine.low %v470_v10, %v478_v14  ;;  %v46_v18 = vcombine.high %v470_v10, %v478_v14  ;;  %v81_v21 = vcombine.low %v472_v11, %v480_v15 }
  0x14   :  { %v80_v24 = vcombine.high %v464_v7, %v468_v9  ;;  %v82_v25 = vcombine.high %v472_v11, %v480_v15  ;;  %v135_v46 = vunpack.c.l.s4 %v434_v45  ;;  %v435_v47 = vmov 842150450  }
  0x15   :  { %v460_v5 = vsub.s32 %v49_v4, %v51_v3  ;;  %v142_v48 = vunpack.c.l.s4 %v435_v47  ;;  %v436_v49 = vmov 1414812756   ;;  %v437_v51 = vmov 1987475062  }
  0x16   :  { %v149_v50 = vunpack.c.l.s4 %v436_v49  ;;  %v156_v52 = vunpack.c.l.s4 %v437_v51  ;;  %v136_v53 = vunpack.c.0.s8 %v135_v46 }
  0x17   :  { %v53_v19 = vrot.slane %v43_v12, %v460_v5  ;;  %v60_v20 = vrot.slane %v44_v13, %v460_v5  ;;  %v67_v22 = vrot.slane %v45_v17, %v460_v5  ;;  %v74_v23 = vrot.slane %v46_v18, %v460_v5 }
  0x18   :  { %v89_v26 = vrot.slane %v79_v16, %v460_v5  ;;  %v103_v30 = vrot.slane %v81_v21, %v460_v5  ;;  %v96_v33 = vrot.slane %v80_v24, %v460_v5  ;;  %v110_v34 = vrot.slane %v82_v25, %v460_v5 }
  0x19   :  { %v75_v27 = vcombine.low %v53_v19, %v67_v22  ;;  %v76_v28 = vcombine.high %v53_v19, %v67_v22  ;;  %v77_v29 = vcombine.low %v60_v20, %v74_v23  ;;  %v78_v31 = vcombine.high %v60_v20, %v74_v23 }
  0x1a   :  { %v111_v35 = vcombine.low %v89_v26, %v103_v30  ;;  %v112_v37 = vcombine.high %v89_v26, %v103_v30  ;;  %v113_v39 = vcombine.low %v96_v33, %v110_v34  ;;  %v114_v41 = vcombine.high %v96_v33, %v110_v34 }
  0x1b   :  { %v123_v32 = vadd.f32 %v76_v28, %v75_v27  ;;  %v143_v54 = vunpack.c.0.s8 %v142_v48  ;;  %v150_v55 = vunpack.c.0.s8 %v149_v50  ;;  %v157_v56 = vunpack.c.0.s8 %v156_v52 }
  0x1c   :  { %v502_v57 = vsub.s32 %v136_v53, %v51_v3 }
  0x1d   :  { %v124_v36 = vadd.f32 %v123_v32, %v77_v29  ;;  %v504_v58 = vsub.s32 %v143_v54, %v51_v3  ;;  %v506_v59 = vsub.s32 %v150_v55, %v51_v3  ;;  %v508_v60 = vsub.s32 %v157_v56, %v51_v3 }
  0x1f   :  { %v125_v38 = vadd.f32 %v124_v36, %v78_v31 }
  0x21   :  { %v126_v40 = vadd.f32 %v125_v38, %v111_v35 }
  0x23   :  { %v127_v42 = vadd.f32 %v126_v40, %v112_v37 }
  0x25   :  { %v128_v43 = vadd.f32 %v127_v42, %v113_v39 }
  0x27   :  { %v129_v44 = vadd.f32 %v128_v43, %v114_v41 }
  0x29   :  { %130 = vadd.xlane.f32.xlu0 %v129_v44 }
  0xb2   :  { %v131_v61 = vpop.xlane.xlu0 %130 }
  0xb3   :  { %v132_v62 = vmul.f32 0.0009765625, %v131_v61 }
  0xb5   :  { %v140_v63 = vrot.slane %v132_v62, %v502_v57  ;;  %v147_v0 = vrot.slane %v132_v62, %v504_v58  ;;  %v154_v1 = vrot.slane %v132_v62, %v506_v59  ;;  %v161_v2 = vrot.slane %v132_v62, %v508_v60 }
  0xb7   :  { %v515_v4 = vsub.f32 %v462_v6, %v140_v63  ;;  %v518_v12 = vsub.f32 %v464_v7, %v140_v63  ;;  %v521_v13 = vsub.f32 %v466_v8, %v147_v0  ;;  %v524_v3 = vsub.f32 %v468_v9, %v147_v0 }
  0xb8   :  { %v527_v16 = vsub.f32 %v470_v10, %v154_v1  ;;  %v530_v17 = vsub.f32 %v472_v11, %v154_v1  ;;  %v533_v18 = vsub.f32 %v478_v14, %v161_v2  ;;  %v536_v19 = vsub.f32 %v480_v15, %v161_v2 }
  0xb9   :  { %v174_v20 = vmul.f32 %v515_v4, %v515_v4  ;;  %v176_v21 = vmul.f32 %v521_v13, %v521_v13  ;;  %v175_v22 = vmul.f32 %v518_v12, %v518_v12  ;;  %v177_v23 = vmul.f32 %v524_v3, %v524_v3 }
  0xba   :  { %v178_v24 = vmul.f32 %v527_v16, %v527_v16  ;;  %v180_v25 = vmul.f32 %v533_v18, %v533_v18  ;;  %v179_v26 = vmul.f32 %v530_v17, %v530_v17  ;;  %v181_v27 = vmul.f32 %v536_v19, %v536_v19 }
  0xbb   :  { %v190_v28 = vcombine.low %v174_v20, %v176_v21  ;;  %v191_v29 = vcombine.high %v174_v20, %v176_v21  ;;  %v226_v33 = vcombine.low %v175_v22, %v177_v23  ;;  %v227_v40 = vcombine.high %v175_v22, %v177_v23 }
  0xbc   :  { %v192_v30 = vcombine.low %v178_v24, %v180_v25  ;;  %v193_v31 = vcombine.high %v178_v24, %v180_v25  ;;  %v228_v37 = vcombine.low %v179_v26, %v181_v27  ;;  %v229_v41 = vcombine.high %v179_v26, %v181_v27 }
  0xbd   :  { %v200_v32 = vrot.slane %v190_v28, %v460_v5  ;;  %v207_v35 = vrot.slane %v191_v29, %v460_v5  ;;  %v236_v43 = vrot.slane %v226_v33, %v460_v5  ;;  %v243_v48 = vrot.slane %v227_v40, %v460_v5 }
  0xbe   :  { %v214_v34 = vrot.slane %v192_v30, %v460_v5  ;;  %v221_v36 = vrot.slane %v193_v31, %v460_v5  ;;  %v250_v44 = vrot.slane %v228_v37, %v460_v5  ;;  %v257_v49 = vrot.slane %v229_v41, %v460_v5 }
  0xbf   :  { %v325_v2 = vstv %s591_s0 }
  0xc0   :  { %v222_v38 = vcombine.low %v200_v32, %v214_v34  ;;  %v223_v39 = vcombine.high %v200_v32, %v214_v34  ;;  %v224_v42 = vcombine.low %v207_v35, %v221_v36  ;;  %v225_v46 = vcombine.high %v207_v35, %v221_v36 }
  0xc1   :  { %v258_v50 = vcombine.low %v236_v43, %v250_v44  ;;  %v259_v52 = vcombine.high %v236_v43, %v250_v44  ;;  %v260_v54 = vcombine.low %v243_v48, %v257_v49  ;;  %v261_v56 = vcombine.high %v243_v48, %v257_v49 }
  0xc2   :  { %v270_v45 = vadd.f32 %v223_v39, %v222_v38  ;;  %v327_v21 = vmul.f32 %v325_v2, %v464_v7  ;;  %v329_v22 = vmul.f32 %v325_v2, %v468_v9  ;;  %v326_v23 = vmul.f32 %v325_v2, %v462_v6 }
  0xc3   :  { %v328_v24 = vmul.f32 %v325_v2, %v466_v8  ;;  %v331_v29 = vmul.f32 %v325_v2, %v472_v11  ;;  %v333_v30 = vmul.f32 %v325_v2, %v480_v15  ;;  %v330_v7 = vmul.f32 %v325_v2, %v470_v10 }
  0xc4   :  { %v271_v47 = vadd.f32 %v270_v45, %v224_v42  ;;  %v332_v9 = vmul.f32 %v325_v2, %v478_v14 }
  0xc6   :  { %v272_v51 = vadd.f32 %v271_v47, %v225_v46 }
  0xc8   :  { %v273_v53 = vadd.f32 %v272_v51, %v258_v50 }
  0xca   :  { %v274_v55 = vadd.f32 %v273_v53, %v259_v52 }
  0xcc   :  { %v275_v61 = vadd.f32 %v274_v55, %v260_v54 }
  0xce   :  { %v276_v62 = vadd.f32 %v275_v61, %v261_v56 }
  0xd0   :  { %277 = vadd.xlane.f32.xlu0 %v276_v62 }
 0x159   :  { %v278_v63 = vpop.xlane.xlu0 %277 }
 0x15a   :  { %v279_v0 = vmul.f32 0.0009765625, %v278_v63 }
 0x15c   :  { %v280_v1 = vadd.f32 1e-05, %v279_v0 }
 0x15e   :  { %384 = vrsqrt.f32 %v280_v1 }
 0x16b   :  { %v385_v20 = vpop.eup %384 }
 0x16c   :  { %v282_v5 = vmul.f32 0.7, %v385_v20 }
 0x16e   :  { %v291_v25 = vrot.slane %v282_v5, %v502_v57  ;;  %v298_v26 = vrot.slane %v282_v5, %v504_v58  ;;  %v305_v27 = vrot.slane %v282_v5, %v506_v59  ;;  %v312_v28 = vrot.slane %v282_v5, %v508_v60 }
 0x170   :  { %v317_v6 = vmul.f32 %v291_v25, %v515_v4  ;;  %v318_v8 = vmul.f32 %v291_v25, %v518_v12  ;;  %v319_v57 = vmul.f32 %v298_v26, %v521_v13  ;;  %v320_v58 = vmul.f32 %v298_v26, %v524_v3 }
 0x171   :  { %v321_v59 = vmul.f32 %v305_v27, %v527_v16  ;;  %v322_v60 = vmul.f32 %v305_v27, %v530_v17  ;;  %v323_v11 = vmul.f32 %v312_v28, %v533_v18  ;;  %v324_v15 = vmul.f32 %v312_v28, %v536_v19 }
 0x172   :  { %v334_v31 = vadd.f32 %v326_v23, %v317_v6  ;;  %v335_v10 = vadd.f32 %v327_v21, %v318_v8  ;;  %v336_v32 = vadd.f32 %v328_v24, %v319_v57  ;;  %v337_v14 = vadd.f32 %v329_v22, %v320_v58 }
 0x173   :  { %v338_v33 = vadd.f32 %v330_v7, %v321_v59  ;;  %v339_v4 = vadd.f32 %v331_v29, %v322_v60  ;;  %v340_v34 = vadd.f32 %v332_v9, %v323_v11  ;;  %v341_v12 = vadd.f32 %v333_v30, %v324_v15 }
 0x174   :  { %342 = vst [vmem:[#allocation6] sm:$0xff] %v334_v31  ;;  %343 = vst [vmem:[#allocation6 + $0x8] sm:$0xff] %v335_v10 }
 0x175   :  { %344 = vst [vmem:[#allocation6 + $0x10] sm:$0xff] %v336_v32  ;;  %345 = vst [vmem:[#allocation6 + $0x18] sm:$0xff] %v337_v14 }
 0x176   :  { %346 = vst [vmem:[#allocation6 + $0x20] sm:$0xff] %v338_v33  ;;  %347 = vst [vmem:[#allocation6 + $0x28] sm:$0xff] %v339_v4 }
 0x177   :  { %348 = vst [vmem:[#allocation6 + $0x30] sm:$0xff] %v340_v34  ;;  %349 = vst [vmem:[#allocation6 + $0x38] sm:$0xff] %v341_v12 }
 0x178   :  { %354 = vsyncadd [#allocation5], 768  ;;  %s438_s0 = smov [#allocation6]  }
 0x179   :  { %s355_s18 = sshll.u32 %s438_s0, 4  ;;  %s356_s18 = int_to_ptr.vmem [resolvable:$true] %s355_s18 }
 0x17a   :  { %s406_s19 = scalar_lea.vmem %s356_s18, 256  ;;  %s410_s20 = scalar_lea.vmem %s356_s18, 1024 }
 0x17b   :  { %p407_p5 = scmp.ne.s32.totalorder %s356_s18, %s406_s19  ;;  %p411_p6 = scmp.lt.s32.totalorder %s356_s18, %s356_s18 }
 0x17c   :  { %p412_p7 = scmp.lt.s32.totalorder %s410_s20, %s406_s19 }
 0x17e   :  { %p413_p8 = por %p412_p7, %p411_p6 }
 0x180   :  { %p414_p9 = pnand %p413_p8, %p407_p5 }
 0x182   :  { %417 = shalt.err (!%p414_p9)
}
 0x183   :  { %361 = dma.vmem_to_hbm [thread:$0]  %s356_s18, 256, %s593_s2, [#allocation5], %s431_s13, %s431_s13, %s432_s14  }
 0x184   :  { %428 = dma.done.wait [#allocation5], 1024  }
 0x185   :  { %429 = vsyncadd [#allocation5], 4294966272 }
 0x186   :  { %365 = vsyncpa [#allocation4], 1 }
 0x187   :  { %366 = vsyncpa [#allocation5], 1 }

</bundles_post_ra>
